<compile_context>
chip_gen: v7x
topology: tpu7x:2x2x1
jax: 0.10.0
libtpu: 0.0.40
codegen_flags: <defaults>
</compile_context>

<pallas_src>
import functools
import jax
import jax.numpy as jnp
from jax.experimental import pallas as pl
from jax.experimental.pallas import tpu as pltpu

_LANE = 128


# --------------------------------------------------------------------------
# Generation-aware VMEM budgets
# --------------------------------------------------------------------------
def _vmem_budgets():
    """Returns (double-buffered block budget, scoped vmem limit) in bytes."""
    cap = 64 * 1024 * 1024                       # conservative default (v7x-sized)
    try:
        cap = int(getattr(pltpu.get_tpu_info(), "vmem_capacity_bytes", cap))
    except Exception:
        pass
    budget = int(cap * 0.70)                     # streaming blocks (double-buffered)
    limit = int(cap * 0.85)                      # leave headroom for params/scratch
    return budget, limit


def _pick_thw(hw_pad, single_lane_bytes, total_lane_bytes, budget_bytes,
              target_block_bytes=8 * 1024 * 1024, min_tiles=2):
    """Largest spatial tile (multiple of 128 dividing hw_pad) such that the
    aggregate double-buffered blocks stay under budget_bytes, each single block
    is ~target_block_bytes, and (when possible) there are >= min_tiles steps."""
    cap = budget_bytes // max(total_lane_bytes, 1)
    cap = min(cap, max(target_block_bytes // max(single_lane_bytes, 1), _LANE))
    if hw_pad >= min_tiles * _LANE:
        cap = min(cap, hw_pad // min_tiles)
    cap = min(cap, hw_pad)
    thw = max(_LANE, (cap // _LANE) * _LANE)
    while hw_pad % thw != 0:
        thw -= _LANE
    return thw


# --------------------------------------------------------------------------
# Shared attention-weight computation (tiny; runs once per batch element)
# dense1 (1x1 conv, MXU) + BN(eval, eps) + Mish + grouped dense2 (MXU) +
# softmax over the channel dim of each radix chunk.
# --------------------------------------------------------------------------
def _attention_weights(pooled, w1t_ref, b1_ref, gamma_ref, beta_ref,
                       rmean_ref, rvar_ref, w2t_ref, b2_ref, *, r, eps):
    d1 = jnp.dot(pooled, w1t_ref[...],
                 preferred_element_type=jnp.float32,
                 precision=jax.lax.Precision.HIGHEST) + b1_ref[...]      # (1, inner)
    inv = jax.lax.rsqrt(rvar_ref[...] + eps)
    bnv = (d1 - rmean_ref[...]) * inv * gamma_ref[...] + beta_ref[...]
    # Mish: x * tanh(softplus(x)) with numerically stable softplus
    sp = jnp.maximum(bnv, 0.0) + jnp.log1p(jnp.exp(-jnp.abs(bnv)))
    mish = bnv * jnp.tanh(sp)                                            # (1, inner)
    inner = mish.shape[-1]
    ig = inner // r
    out = []
    for g in range(r):                                                   # tiny static loop
        mish_g = mish[:, g * ig:(g + 1) * ig]                            # (1, ig)
        dg = jnp.dot(mish_g, w2t_ref[g],
                     preferred_element_type=jnp.float32,
                     precision=jax.lax.Precision.HIGHEST) + b2_ref[g]    # (1, C)
        dg = dg - jnp.max(dg, axis=-1, keepdims=True)
        e = jnp.exp(dg)
        out.append(e / jnp.sum(e, axis=-1, keepdims=True))               # (1, C)
    return out


# --------------------------------------------------------------------------
# Fused kernel: one batch element per grid step, everything in VMEM.
# --------------------------------------------------------------------------
def _fused_kernel(*refs, r, hw_true, eps):
    x_refs = refs[:r]                                  # r x (1, C, HWp)
    param_refs = refs[r:r + 8]
    out_ref = refs[r + 8]                              # (1, C, HWp)

    # AddN + global average pool (padded lanes are zero; divide by true HW)
    xsum = x_refs[0][...]
    for g in range(1, r):
        xsum = xsum + x_refs[g][...]
    pooled = jnp.sum(xsum, axis=-1) * (1.0 / hw_true)  # (1, C)

    s = _attention_weights(pooled, *param_refs, r=r, eps=eps)

    acc = s[0][:, :, None] * x_refs[0][...]
    for g in range(1, r):
        acc = acc + s[g][:, :, None] * x_refs[g][...]
    out_ref[...] = acc


# --------------------------------------------------------------------------
# Fallback kernel A: streaming AddN + pool, weight computation fused into the
# last spatial step.  grid = (N, HWp // thw), ("parallel", "arbitrary").
# --------------------------------------------------------------------------
def _pool_weights_kernel(*refs, r, hw_true, eps):
    x_refs = refs[:r]                                  # r x (1, C, thw)
    param_refs = refs[r:r + 8]
    s_ref = refs[r + 8]                                # (1, r, C)   output
    acc_ref = refs[r + 9]                              # (1, C)      VMEM scratch
    i = pl.program_id(1)

    @pl.when(i == 0)
    def _():
        acc_ref[...] = jnp.zeros_like(acc_ref)

    xsum = x_refs[0][...]
    for g in range(1, r):
        xsum = xsum + x_refs[g][...]
    acc_ref[...] += jnp.sum(xsum, axis=-1)             # (1, C)

    @pl.when(i == pl.num_programs(1) - 1)
    def _():
        pooled = acc_ref[...] * (1.0 / hw_true)
        s = _attention_weights(pooled, *param_refs, r=r, eps=eps)
        s_ref[...] = jnp.stack(s, axis=1)              # (1, r, C)


# --------------------------------------------------------------------------
# Fallback kernel B: streaming apply  out = sum_g s_g * x_g.
# grid = (N, HWp // thw), ("parallel", "parallel").
# --------------------------------------------------------------------------
def _apply_kernel(*refs, r):
    s_ref = refs[0]                                    # (1, r, C)
    x_refs = refs[1:1 + r]                             # r x (1, C, thw)
    out_ref = refs[1 + r]                              # (1, C, thw)
    s = s_ref[...]
    acc = s[:, 0, :][:, :, None] * x_refs[0][...]
    for g in range(1, r):
        acc = acc + s[:, g, :][:, :, None] * x_refs[g][...]
    out_ref[...] = acc


# --------------------------------------------------------------------------
# Wrapper
# --------------------------------------------------------------------------
def split_attention_pallas(inputs_list, params, *, eps=1e-3, force_path="auto"):
    r = len(inputs_list)
    N, C, H, W = inputs_list[0].shape
    HW = H * W
    HWp = ((HW + _LANE - 1) // _LANE) * _LANE

    w1, b1, gamma, beta, rmean, rvar, w2, b2 = params
    inner = w1.shape[0]
    ig = inner // r
    w1t = jnp.transpose(w1)                            # (C, inner)
    w2t = jnp.transpose(w2, (0, 2, 1))                 # (r, ig, C)

    # Free, contiguous reshape to lane-dense spatial layout; zero-pad HW to a
    # multiple of 128 when needed (mean still divides by true HW).
    xs = [t.reshape(N, C, HW).astype(jnp.float32) for t in inputs_list]
    if HWp != HW:
        xs = [jnp.pad(x, ((0, 0), (0, 0), (0, HWp - HW))) for x in xs]

    budget, vmem_limit = _vmem_budgets()
    param_ops = (w1t, b1, gamma, beta, rmean, rvar, w2t, b2)

    def _param_specs(c2, c3):
        return [
            pl.BlockSpec((C, inner), c2),              # w1t
            pl.BlockSpec((1, inner), c2),              # b1
            pl.BlockSpec((1, inner), c2),              # gamma
            pl.BlockSpec((1, inner), c2),              # beta
            pl.BlockSpec((1, inner), c2),              # running_mean
            pl.BlockSpec((1, inner), c2),              # running_var
            pl.BlockSpec((r, ig, C), c3),              # w2t
            pl.BlockSpec((r, 1, C), c3),               # b2
        ]

    # Fused path needs the (double-buffered) per-batch radix slabs + output in VMEM.
    fused_bytes = 2 * (r + 1) * C * HWp * 4
    use_fused = (force_path == "fused") or (force_path == "auto" and fused_bytes <= budget)

    if use_fused:
        # TODO(synk): when N == 1 on v7x this leaves one TensorCore idle; a
        # 2-way spatial split with partial pooled accumulators would engage both.
        out = pl.pallas_call(
            functools.partial(_fused_kernel, r=r, hw_true=float(HW), eps=eps),
            out_shape=jax.ShapeDtypeStruct((N, C, HWp), jnp.float32),
            grid_spec=pltpu.PrefetchScalarGridSpec(
                num_scalar_prefetch=0,
                grid=(N,),
                in_specs=[pl.BlockSpec((1, C, HWp), lambda n: (n, 0, 0))
                          for _ in range(r)]
                         + _param_specs(lambda n: (0, 0), lambda n: (0, 0, 0)),
                out_specs=pl.BlockSpec((1, C, HWp), lambda n: (n, 0, 0))),
            compiler_params=pltpu.CompilerParams(
                dimension_semantics=("parallel",),
                vmem_limit_bytes=vmem_limit),
        )(*xs, *param_ops)
    else:
        # ---- kernel A: streaming AddN + pool with fused weight epilogue ----
        thw_pool = _pick_thw(HWp, C * 4, 2 * r * C * 4, budget)
        s = pl.pallas_call(
            functools.partial(_pool_weights_kernel, r=r, hw_true=float(HW), eps=eps),
            out_shape=jax.ShapeDtypeStruct((N, r, C), jnp.float32),
            grid_spec=pltpu.PrefetchScalarGridSpec(
                num_scalar_prefetch=0,
                grid=(N, HWp // thw_pool),
                in_specs=[pl.BlockSpec((1, C, thw_pool), lambda n, i: (n, 0, i))
                          for _ in range(r)]
                         + _param_specs(lambda n, i: (0, 0), lambda n, i: (0, 0, 0)),
                out_specs=pl.BlockSpec((1, r, C), lambda n, i: (n, 0, 0)),
                scratch_shapes=[pltpu.VMEM((1, C), jnp.float32)]),
            compiler_params=pltpu.CompilerParams(
                dimension_semantics=("parallel", "arbitrary"),
                vmem_limit_bytes=vmem_limit),
        )(*xs, *param_ops)

        # ---- kernel B: streaming apply  out = sum_g s_g * x_g ----
        thw_apply = _pick_thw(HWp, C * 4, 2 * (r + 1) * C * 4, budget)
        out = pl.pallas_call(
            functools.partial(_apply_kernel, r=r),
            out_shape=jax.ShapeDtypeStruct((N, C, HWp), jnp.float32),
            grid_spec=pltpu.PrefetchScalarGridSpec(
                num_scalar_prefetch=0,
                grid=(N, HWp // thw_apply),
                in_specs=[pl.BlockSpec((1, r, C), lambda n, i: (n, 0, 0))]
                         + [pl.BlockSpec((1, C, thw_apply), lambda n, i: (n, 0, i))
                            for _ in range(r)],
                out_specs=pl.BlockSpec((1, C, thw_apply), lambda n, i: (n, 0, i))),
            compiler_params=pltpu.CompilerParams(
                dimension_semantics=("parallel", "parallel"),
                vmem_limit_bytes=vmem_limit),
        )(s, *xs)

    if HWp != HW:
        out = out[:, :, :HW]
    return out.reshape(N, C, H, W)


# --------------------------------------------------------------------------
# Pure-JAX reference (mirrors the PyTorch forward, BN in eval mode)
# --------------------------------------------------------------------------
def split_attention_ref(inputs_list, params, eps=1e-3):
    w1, b1, gamma, beta, rmean, rvar, w2, b2 = params
    r = len(inputs_list)
    inner = w1.shape[0]
    ig = inner // r
    added = sum(inputs_list)                                       # AddN
    gp = jnp.mean(added, axis=(2, 3))                              # global avg pool (N, C)
    d1 = jnp.dot(gp, w1.T, precision=jax.lax.Precision.HIGHEST) + b1[0]
    bnv = (d1 - rmean[0]) * jax.lax.rsqrt(rvar[0] + eps) * gamma[0] + beta[0]
    sp = jnp.maximum(bnv, 0.0) + jnp.log1p(jnp.exp(-jnp.abs(bnv)))
    mish = bnv * jnp.tanh(sp)
    out = 0.0
    for g in range(r):
        dg = jnp.dot(mish[:, g * ig:(g + 1) * ig], w2[g].T,
                     precision=jax.lax.Precision.HIGHEST) + b2[g, 0]
        sm = jax.nn.softmax(dg, axis=1)
        out = out + sm[:, :, None, None] * inputs_list[g]
    return out


if __name__ == "__main__":
    # small shapes consistent with the module
    r, N, C, H, W = 2, 2, 4, 16, 16
    inner = 8                                                      # divisible by r

    key = jax.random.PRNGKey(0)
    ks = jax.random.split(key, 14)

    # deterministic synthetic parameters (shapes per the module __init__)
    w1 = 0.2 * jax.random.normal(ks[0], (inner, C), jnp.float32)           # Conv2d(C->inner, 1x1)
    b1 = 0.1 * jax.random.normal(ks[1], (1, inner), jnp.float32)
    gamma = 1.0 + 0.1 * jax.random.normal(ks[2], (1, inner), jnp.float32)  # BN weight
    beta = 0.1 * jax.random.normal(ks[3], (1, inner), jnp.float32)         # BN bias
    rmean = 0.1 * jax.random.normal(ks[4], (1, inner), jnp.float32)        # BN running_mean
    rvar = 0.5 + 0.2 * jnp.abs(jax.random.normal(ks[5], (1, inner), jnp.float32))
    w2 = 0.2 * jax.random.normal(ks[6], (r, C, inner // r), jnp.float32)   # grouped Conv2d(inner->C*r)
    b2 = 0.1 * jax.random.normal(ks[7], (r, 1, C), jnp.float32)
    params = (w1, b1, gamma, beta, rmean, rvar, w2, b2)

    inputs_list = [jax.random.normal(ks[8 + i], (N, C, H, W), jnp.float32)
                   for i in range(r)]
    ref = split_attention_ref(inputs_list, params)

    # Default (fully fused, single pallas_call) path
    out_fused = jax.block_until_ready(split_attention_pallas(inputs_list, params))
    assert out_fused.shape == (N, C, H, W)
    assert jnp.allclose(out_fused, ref, atol=1e-5, rtol=1e-5), "fused path mismatch"

    # Force the streaming split path so both code paths are exercised
    out_split = jax.block_until_ready(
        split_attention_pallas(inputs_list, params, force_path="split"))
    assert jnp.allclose(out_split, ref, atol=1e-5, rtol=1e-5), "split path mismatch"

    # Non-multiple-of-128 spatial size exercises the lane-padding path (14*14=196)
    inputs_pad = [jax.random.normal(ks[10 + i], (N, C, 14, 14), jnp.float32)
                  for i in range(r)]
    ref_pad = split_attention_ref(inputs_pad, params)
    out_pad = jax.block_until_ready(split_attention_pallas(inputs_pad, params))
    assert jnp.allclose(out_pad, ref_pad, atol=1e-5, rtol=1e-5), "padded path mismatch"

    print("KERNEL_OK")
</pallas_src>

<mosaic_0001>
module attributes {stable_mosaic.version = 11 : i64} {
  func.func @_fused_kernel(%arg0: i32, %arg1: memref<1x4x256xf32, #tpu.memory_space<vmem>>, %arg2: memref<1x4x256xf32, #tpu.memory_space<vmem>>, %arg3: memref<4x8xf32, #tpu.memory_space<vmem>>, %arg4: memref<1x8xf32, #tpu.memory_space<vmem>>, %arg5: memref<1x8xf32, #tpu.memory_space<vmem>>, %arg6: memref<1x8xf32, #tpu.memory_space<vmem>>, %arg7: memref<1x8xf32, #tpu.memory_space<vmem>>, %arg8: memref<1x8xf32, #tpu.memory_space<vmem>>, %arg9: memref<2x4x4xf32, #tpu.memory_space<vmem>>, %arg10: memref<2x1x4xf32, #tpu.memory_space<vmem>>, %arg11: memref<1x4x256xf32, #tpu.memory_space<vmem>>) attributes {dimension_semantics = [#tpu.dimension_semantics<parallel>], iteration_bounds = array<i64: 2>, scalar_prefetch = 0 : i64, scratch_operands = 0 : i64, tpu.core_type = #tpu.core_type<tc>, window_params = [{transform_indices = @transform_0, window_bounds = array<i64: 1, 4, 256>}, {transform_indices = @transform_1, window_bounds = array<i64: 1, 4, 256>}, {pipeline_mode = #tpu.pipeline_mode<synchronous>, transform_indices = @transform_2, window_bounds = array<i64: 4, 8>}, {pipeline_mode = #tpu.pipeline_mode<synchronous>, transform_indices = @transform_3, window_bounds = array<i64: 1, 8>}, {pipeline_mode = #tpu.pipeline_mode<synchronous>, transform_indices = @transform_4, window_bounds = array<i64: 1, 8>}, {pipeline_mode = #tpu.pipeline_mode<synchronous>, transform_indices = @transform_5, window_bounds = array<i64: 1, 8>}, {pipeline_mode = #tpu.pipeline_mode<synchronous>, transform_indices = @transform_6, window_bounds = array<i64: 1, 8>}, {pipeline_mode = #tpu.pipeline_mode<synchronous>, transform_indices = @transform_7, window_bounds = array<i64: 1, 8>}, {pipeline_mode = #tpu.pipeline_mode<synchronous>, transform_indices = @transform_8, window_bounds = array<i64: 2, 4, 4>}, {pipeline_mode = #tpu.pipeline_mode<synchronous>, transform_indices = @transform_9, window_bounds = array<i64: 2, 1, 4>}, {transform_indices = @transform_10, window_bounds = array<i64: 1, 4, 256>}]} {
    %c0 = arith.constant 0 : index
    %c0_0 = arith.constant 0 : index
    %c0_1 = arith.constant 0 : index
    %0 = vector.load %arg1[%c0, %c0_0, %c0_1] : memref<1x4x256xf32, #tpu.memory_space<vmem>>, vector<1x4x256xf32>
    %c0_2 = arith.constant 0 : index
    %c0_3 = arith.constant 0 : index
    %c0_4 = arith.constant 0 : index
    %1 = vector.load %arg2[%c0_2, %c0_3, %c0_4] : memref<1x4x256xf32, #tpu.memory_space<vmem>>, vector<1x4x256xf32>
    %2 = arith.addf %0, %1 : vector<1x4x256xf32>
    %cst = arith.constant dense<0.000000e+00> : vector<1x4xf32>
    %3 = vector.multi_reduction <add>, %2, %cst [2] : vector<1x4x256xf32> to vector<1x4xf32>
    %cst_5 = arith.constant 3.906250e-03 : f32
    %4 = vector.broadcast %cst_5 : f32 to vector<1x4xf32>
    %5 = arith.mulf %3, %4 : vector<1x4xf32>
    %c0_6 = arith.constant 0 : index
    %c0_7 = arith.constant 0 : index
    %6 = vector.load %arg3[%c0_6, %c0_7] : memref<4x8xf32, #tpu.memory_space<vmem>>, vector<4x8xf32>
    %cst_8 = arith.constant dense<0.000000e+00> : vector<1x8xf32>
    %7 = tpu.matmul %5, %6, %cst_8 {dimension_numbers = #tpu.dot_dimension_numbers<[1], [0], [0], [1], [0, 0, 1, 1], [], []>, precision = #tpu.contract_precision<fp32>} : vector<1x4xf32>, vector<4x8xf32>, vector<1x8xf32> -> vector<1x8xf32>
    %c0_9 = arith.constant 0 : index
    %c0_10 = arith.constant 0 : index
    %8 = vector.load %arg4[%c0_9, %c0_10] : memref<1x8xf32, #tpu.memory_space<vmem>>, vector<1x8xf32>
    %9 = arith.addf %7, %8 : vector<1x8xf32>
    %c0_11 = arith.constant 0 : index
    %c0_12 = arith.constant 0 : index
    %10 = vector.load %arg8[%c0_11, %c0_12] : memref<1x8xf32, #tpu.memory_space<vmem>>, vector<1x8xf32>
    %cst_13 = arith.constant 1.000000e-03 : f32
    %11 = vector.broadcast %cst_13 : f32 to vector<1x8xf32>
    %12 = arith.addf %10, %11 : vector<1x8xf32>
    %13 = math.rsqrt %12 : vector<1x8xf32>
    %c0_14 = arith.constant 0 : index
    %c0_15 = arith.constant 0 : index
    %14 = vector.load %arg7[%c0_14, %c0_15] : memref<1x8xf32, #tpu.memory_space<vmem>>, vector<1x8xf32>
    %15 = arith.subf %9, %14 : vector<1x8xf32>
    %16 = arith.mulf %15, %13 : vector<1x8xf32>
    %c0_16 = arith.constant 0 : index
    %c0_17 = arith.constant 0 : index
    %17 = vector.load %arg5[%c0_16, %c0_17] : memref<1x8xf32, #tpu.memory_space<vmem>>, vector<1x8xf32>
    %18 = arith.mulf %16, %17 : vector<1x8xf32>
    %c0_18 = arith.constant 0 : index
    %c0_19 = arith.constant 0 : index
    %19 = vector.load %arg6[%c0_18, %c0_19] : memref<1x8xf32, #tpu.memory_space<vmem>>, vector<1x8xf32>
    %20 = arith.addf %18, %19 : vector<1x8xf32>
    %cst_20 = arith.constant 0.000000e+00 : f32
    %21 = vector.broadcast %cst_20 : f32 to vector<1x8xf32>
    %22 = arith.maximumf %20, %21 : vector<1x8xf32>
    %23 = math.absf %20 : vector<1x8xf32>
    %cst_21 = arith.constant 0.000000e+00 : f32
    %24 = vector.broadcast %cst_21 : f32 to vector<1x8xf32>
    %25 = arith.subf %24, %23 : vector<1x8xf32>
    %26 = math.exp %25 : vector<1x8xf32>
    %27 = math.log1p %26 : vector<1x8xf32>
    %28 = arith.addf %22, %27 : vector<1x8xf32>
    %29 = math.tanh %28 : vector<1x8xf32>
    %30 = arith.mulf %20, %29 : vector<1x8xf32>
    %31 = vector.extract_strided_slice %30 {offsets = [0, 0], sizes = [1, 4], strides = [1, 1]} : vector<1x8xf32> to vector<1x4xf32>
    %c0_22 = arith.constant 0 : index
    %c0_23 = arith.constant 0 : index
    %c0_24 = arith.constant 0 : index
    %32 = vector.load %arg9[%c0_22, %c0_23, %c0_24] : memref<2x4x4xf32, #tpu.memory_space<vmem>>, vector<1x4x4xf32>
    %33 = vector.shape_cast %32 : vector<1x4x4xf32> to vector<4x4xf32>
    %cst_25 = arith.constant dense<0.000000e+00> : vector<1x4xf32>
    %34 = tpu.matmul %31, %33, %cst_25 {dimension_numbers = #tpu.dot_dimension_numbers<[1], [0], [0], [1], [0, 0, 1, 1], [], []>, precision = #tpu.contract_precision<fp32>} : vector<1x4xf32>, vector<4x4xf32>, vector<1x4xf32> -> vector<1x4xf32>
    %c0_26 = arith.constant 0 : index
    %c0_27 = arith.constant 0 : index
    %c0_28 = arith.constant 0 : index
    %35 = vector.load %arg10[%c0_26, %c0_27, %c0_28] : memref<2x1x4xf32, #tpu.memory_space<vmem>>, vector<1x1x4xf32>
    %36 = vector.shape_cast %35 : vector<1x1x4xf32> to vector<1x4xf32>
    %37 = arith.addf %34, %36 : vector<1x4xf32>
    %cst_29 = arith.constant dense<0xFF800000> : vector<1xf32>
    %38 = vector.multi_reduction <maximumf>, %37, %cst_29 [1] : vector<1x4xf32> to vector<1xf32>
    %39 = vector.shape_cast %38 : vector<1xf32> to vector<1x1xf32>
    %40 = vector.broadcast %39 : vector<1x1xf32> to vector<1x4xf32>
    %41 = arith.subf %37, %40 : vector<1x4xf32>
    %42 = math.exp %41 : vector<1x4xf32>
    %cst_30 = arith.constant dense<0.000000e+00> : vector<1xf32>
    %43 = vector.multi_reduction <add>, %42, %cst_30 [1] : vector<1x4xf32> to vector<1xf32>
    %44 = vector.shape_cast %43 : vector<1xf32> to vector<1x1xf32>
    %45 = vector.broadcast %44 : vector<1x1xf32> to vector<1x4xf32>
    %46 = arith.divf %42, %45 : vector<1x4xf32>
    %47 = vector.extract_strided_slice %30 {offsets = [0, 4], sizes = [1, 4], strides = [1, 1]} : vector<1x8xf32> to vector<1x4xf32>
    %c1 = arith.constant 1 : index
    %c0_31 = arith.constant 0 : index
    %c0_32 = arith.constant 0 : index
    %48 = vector.load %arg9[%c1, %c0_31, %c0_32] : memref<2x4x4xf32, #tpu.memory_space<vmem>>, vector<1x4x4xf32>
    %49 = vector.shape_cast %48 : vector<1x4x4xf32> to vector<4x4xf32>
    %cst_33 = arith.constant dense<0.000000e+00> : vector<1x4xf32>
    %50 = tpu.matmul %47, %49, %cst_33 {dimension_numbers = #tpu.dot_dimension_numbers<[1], [0], [0], [1], [0, 0, 1, 1], [], []>, precision = #tpu.contract_precision<fp32>} : vector<1x4xf32>, vector<4x4xf32>, vector<1x4xf32> -> vector<1x4xf32>
    %c1_34 = arith.constant 1 : index
    %c0_35 = arith.constant 0 : index
    %c0_36 = arith.constant 0 : index
    %51 = vector.load %arg10[%c1_34, %c0_35, %c0_36] : memref<2x1x4xf32, #tpu.memory_space<vmem>>, vector<1x1x4xf32>
    %52 = vector.shape_cast %51 : vector<1x1x4xf32> to vector<1x4xf32>
    %53 = arith.addf %50, %52 : vector<1x4xf32>
    %cst_37 = arith.constant dense<0xFF800000> : vector<1xf32>
    %54 = vector.multi_reduction <maximumf>, %53, %cst_37 [1] : vector<1x4xf32> to vector<1xf32>
    %55 = vector.shape_cast %54 : vector<1xf32> to vector<1x1xf32>
    %56 = vector.broadcast %55 : vector<1x1xf32> to vector<1x4xf32>
    %57 = arith.subf %53, %56 : vector<1x4xf32>
    %58 = math.exp %57 : vector<1x4xf32>
    %cst_38 = arith.constant dense<0.000000e+00> : vector<1xf32>
    %59 = vector.multi_reduction <add>, %58, %cst_38 [1] : vector<1x4xf32> to vector<1xf32>
    %60 = vector.shape_cast %59 : vector<1xf32> to vector<1x1xf32>
    %61 = vector.broadcast %60 : vector<1x1xf32> to vector<1x4xf32>
    %62 = arith.divf %58, %61 : vector<1x4xf32>
    %63 = vector.shape_cast %46 : vector<1x4xf32> to vector<1x4x1xf32>
    %c0_39 = arith.constant 0 : index
    %c0_40 = arith.constant 0 : index
    %c0_41 = arith.constant 0 : index
    %64 = vector.load %arg1[%c0_39, %c0_40, %c0_41] : memref<1x4x256xf32, #tpu.memory_space<vmem>>, vector<1x4x256xf32>
    %65 = vector.broadcast %63 : vector<1x4x1xf32> to vector<1x4x256xf32>
    %66 = arith.mulf %65, %64 : vector<1x4x256xf32>
    %67 = vector.shape_cast %62 : vector<1x4xf32> to vector<1x4x1xf32>
    %c0_42 = arith.constant 0 : index
    %c0_43 = arith.constant 0 : index
    %c0_44 = arith.constant 0 : index
    %68 = vector.load %arg2[%c0_42, %c0_43, %c0_44] : memref<1x4x256xf32, #tpu.memory_space<vmem>>, vector<1x4x256xf32>
    %69 = vector.broadcast %67 : vector<1x4x1xf32> to vector<1x4x256xf32>
    %70 = arith.mulf %69, %68 : vector<1x4x256xf32>
    %71 = arith.addf %66, %70 : vector<1x4x256xf32>
    %c0_45 = arith.constant 0 : index
    %c0_46 = arith.constant 0 : index
    %c0_47 = arith.constant 0 : index
    %72 = vector.load %arg11[%c0_45, %c0_46, %c0_47] : memref<1x4x256xf32, #tpu.memory_space<vmem>>, vector<1x4x256xf32>
    tpu.vector_store %arg11[%c0_45, %c0_46, %c0_47], %71 {strides = array<i32>} : memref<1x4x256xf32, #tpu.memory_space<vmem>>, vector<1x4x256xf32>,
    return
  }
  func.func @transform_0(%arg0: i32) -> (i32, i32, i32) {
    %c0_i32 = arith.constant 0 : i32
    %c0_i32_0 = arith.constant 0 : i32
    %c0_i32_1 = arith.constant 0 : i32
    return %arg0, %c0_i32, %c0_i32_0 : i32, i32, i32
  }
  func.func @transform_1(%arg0: i32) -> (i32, i32, i32) {
    %c0_i32 = arith.constant 0 : i32
    %c0_i32_0 = arith.constant 0 : i32
    %c0_i32_1 = arith.constant 0 : i32
    return %arg0, %c0_i32, %c0_i32_0 : i32, i32, i32
  }
  func.func @transform_2(%arg0: i32) -> (i32, i32) {
    %c0_i32 = arith.constant 0 : i32
    %c0_i32_0 = arith.constant 0 : i32
    %c0_i32_1 = arith.constant 0 : i32
    return %c0_i32, %c0_i32_0 : i32, i32
  }
  func.func @transform_3(%arg0: i32) -> (i32, i32) {
    %c0_i32 = arith.constant 0 : i32
    %c0_i32_0 = arith.constant 0 : i32
    %c0_i32_1 = arith.constant 0 : i32
    return %c0_i32, %c0_i32_0 : i32, i32
  }
  func.func @transform_4(%arg0: i32) -> (i32, i32) {
    %c0_i32 = arith.constant 0 : i32
    %c0_i32_0 = arith.constant 0 : i32
    %c0_i32_1 = arith.constant 0 : i32
    return %c0_i32, %c0_i32_0 : i32, i32
  }
  func.func @transform_5(%arg0: i32) -> (i32, i32) {
    %c0_i32 = arith.constant 0 : i32
    %c0_i32_0 = arith.constant 0 : i32
    %c0_i32_1 = arith.constant 0 : i32
    return %c0_i32, %c0_i32_0 : i32, i32
  }
  func.func @transform_6(%arg0: i32) -> (i32, i32) {
    %c0_i32 = arith.constant 0 : i32
    %c0_i32_0 = arith.constant 0 : i32
    %c0_i32_1 = arith.constant 0 : i32
    return %c0_i32, %c0_i32_0 : i32, i32
  }
  func.func @transform_7(%arg0: i32) -> (i32, i32) {
    %c0_i32 = arith.constant 0 : i32
    %c0_i32_0 = arith.constant 0 : i32
    %c0_i32_1 = arith.constant 0 : i32
    return %c0_i32, %c0_i32_0 : i32, i32
  }
  func.func @transform_8(%arg0: i32) -> (i32, i32, i32) {
    %c0_i32 = arith.constant 0 : i32
    %c0_i32_0 = arith.constant 0 : i32
    %c0_i32_1 = arith.constant 0 : i32
    %c0_i32_2 = arith.constant 0 : i32
    return %c0_i32, %c0_i32_0, %c0_i32_1 : i32, i32, i32
  }
  func.func @transform_9(%arg0: i32) -> (i32, i32, i32) {
    %c0_i32 = arith.constant 0 : i32
    %c0_i32_0 = arith.constant 0 : i32
    %c0_i32_1 = arith.constant 0 : i32
    %c0_i32_2 = arith.constant 0 : i32
    return %c0_i32, %c0_i32_0, %c0_i32_1 : i32, i32, i32
  }
  func.func @transform_10(%arg0: i32) -> (i32, i32, i32) {
    %c0_i32 = arith.constant 0 : i32
    %c0_i32_0 = arith.constant 0 : i32
    %c0_i32_1 = arith.constant 0 : i32
    return %arg0, %c0_i32, %c0_i32_0 : i32, i32, i32
  }
}

</mosaic_0001>

<bundles_post_ra>
// kernel: tpu_custom_call.1
= control target key start
LH: loop header
LB: loop body
LE: loop exit
PB: predicated region body
PF: predicated region fallthrough
CT: control target
= control target key end

     0   :  { %s2862_s0 = inlined_call_operand.hbm [shape: f32[2,4,256], index: 0, kind: input, shape index: {}]   ;;  %s2863_s1 = inlined_call_operand.hbm [shape: f32[2,4,256], index: 1, kind: input, shape index: {}]   ;;  %s2864_s2 = inlined_call_operand.vmem [shape: f32[4,8], index: 2, kind: input, shape index: {}]   ;;  %s2865_s3 = inlined_call_operand.vmem [shape: f32[1,8], index: 3, kind: input, shape index: {}]   ;;  %s2866_s4 = inlined_call_operand.hbm [shape: f32[1,8], index: 4, kind: input, shape index: {}]   ;;  %s2867_s5 = inlined_call_operand.vmem [shape: f32[1,8], index: 5, kind: input, shape index: {}]   ;;  %s2868_s6 = inlined_call_operand.vmem [shape: f32[1,8], index: 6, kind: input, shape index: {}]   ;;  %s2869_s7 = inlined_call_operand.vmem [shape: f32[1,8], index: 7, kind: input, shape index: {}]   ;;  %s2870_s8 = inlined_call_operand.vmem [shape: f32[2,4,4], index: 8, kind: input, shape index: {}]   ;;  %s2871_s9 = inlined_call_operand.vmem [shape: f32[2,1,4], index: 9, kind: input, shape index: {}]   ;;  %s2872_s10 = inlined_call_operand.hbm [shape: f32[2,4,256], index: 10, kind: output, shape index: {}]  }
   0x1   :  { %2883 = sst [smem:[#allocation18_spill]] %s2866_s4 }
   0x2   :  { %2884 = sst [smem:[#allocation19_spill]] %s2872_s10 }
   0x3   :  { %15 = vsyncpa [#allocation3], 0 }
   0x4   :  { %17 = vsyncpa [#allocation3 + $0x1], 0 }
   0x5   :  { %18 = vsyncpa [#allocation6], 0 }
   0x6   :  { %20 = vsyncpa [#allocation6 + $0x1], 0 }
   0x7   :  { %21 = vsyncpa [#allocation4], 0 }
   0x8   :  { %23 = vsyncpa [#allocation4 + $0x1], 0  ;;  %s2501_s13 = smov 0   ;;  %s2503_s14 = smov 0  }
   0x9   :  { %s2505_s15 = smov 0   ;;  %s2507_s16 = smov 0  }
   0xa LB: > { %2885 = sst [smem:[#allocation13_spill]] %s2425_s13  ;;  %s2522_s17 = sadd.s32 4294967295, %s2437_s16   ;;  %s2437_s16 = sphi %s2507_s16, %s2912_s16   ;;  %s2433_s15 = sphi %s2505_s15, %s2914_s15   ;;  %s2429_s14 = sphi %s2503_s14, %s2916_s14   ;;  %s2425_s13 = sphi %s2501_s13, %s2915_s13  }
   0xb   : > { %2886 = sst [smem:[#allocation14_spill]] %s2433_s15  ;;  %s2009_s18 = sadd.s32 4294967294, %s2437_s16  }
   0xc   : > { %p49_p0 = scmp.ne.s32.totalorder %s2429_s14, %s2425_s13  ;;  %p2875_p1 = scmp.eq.s32.totalorder %s2522_s17, 0 }
   0xd   : > { %p273_p3 = scmp.eq.s32.totalorder %s2009_s18, 1  ;;  %p2010_p5 = scmp.ge.s32.totalorder %s2437_s16, 1 }
   0xe   : > { %p2531_p4 = por %p2875_p1, %p49_p0  ;;  %p280_p7 = scmp.lt.s32.totalorder %s2437_s16, 3 }
   0xf   : > { %p2536_p6 = por %p273_p3, %p49_p0  ;;  %s2439_s22 = smov [#allocation7]  }
  0x10   : > { %s2887_s19 = scalar_select %p2531_p4, 1, 0 }
  0x11   : > { %s2888_s20 = scalar_select %p2536_p6, 1, 0 }
  0x12   : > { %p2541_p8 = pnand %p2010_p5, %p280_p7  ;;  %s299_s23 = sshll.u32 %s2439_s22, 4  ;;  %s300_s23 = int_to_ptr.vmem [resolvable:$true] %s299_s23 }
  0x13   : > { %2889 = sst [smem:[#allocation15_spill]] %s2888_s20  ;;  %s2549_s24 = sadd.s32 1, %s2437_s16  }
  0x14   : > { %s2890_s21 = scalar_select %p2541_p8, 1, 0 }
  0x15   : > { %p2202_p10 = pneg %p2541_p8  ;;  %2891 = sst [smem:[#allocation16_spill]] %s2549_s24 }
  0x16   : > { %s33_s26 = ssub.s32 %s2437_s16, %s2549_s24  ;;  %s36_s28 = sadd.s32 1, %s2433_s15 }
  0x17   : > { %p2553_p11 = pnand %p2202_p10, %p2875_p1  ;;  %p2559_p12 = scmp.eq.s32.totalorder %s33_s26, 0 }
  0x18   : > { %s2894_s4 = sld [smem:[#allocation18_spill]] }
  0x19   : > { %s2893_s27 = scalar_select %p2559_p12, 1, 0 }
  0x1a   : > { %p2277_p3 = pneg %p2553_p11 }
  0x1e   : > { %s2275_s11 = scalar_lea.hbm %s2894_s4, 16 }
  0x1f   : > { %p2276_p0 = scmp.ne.s32.totalorder %s2894_s4, %s2275_s11  ;;  %p2282_p10 = scmp.lt.u32.totalorder %s2275_s11, %s2894_s4 }
  0x21   : > { %p2278_p5 = pnand %p2277_p3, %p2276_p0 }
  0x23   : > { %p2279_p7 = pneg %p2278_p5 }
  0x25   : > { %p2284_p9 = pnand %p2282_p10, %p2279_p7 }
  0x27   : > { %2287 = shalt.err (!%p2284_p9)
}
  0x28   : > { %s2288_s26 = scalar_lea.vmem %s300_s23, 16  ;;  %s2295_s29 = scalar_lea.vmem %s300_s23, 32 }
  0x29   : > { %p2289_p1 = scmp.ne.s32.totalorder %s300_s23, %s2288_s26  ;;  %p2296_p6 = scmp.lt.s32.totalorder %s300_s23, %s300_s23 }
  0x2a   : > { %p2297_p4 = scmp.lt.s32.totalorder %s2295_s29, %s2288_s26 }
  0x2b   : > { %p2291_p2 = pnand %p2289_p1, %p2277_p3 }
  0x2c   : > { %p2298_p8 = por %p2297_p4, %p2296_p6 }
  0x2d   : > { %p2292_p13 = pneg %p2291_p2 }
  0x2f   : > { %p2299_p12 = pnand %p2298_p8, %p2292_p13 }
  0x31   : > { %2302 = shalt.err (!%p2299_p12)
}
  0x32   : > { %2205 = dma.hbm_to_vmem [thread:$0]  (!%p2553_p11), %s2894_s4, 16, %s300_s23, [#allocation6]  }
  0x33   : > { %p2895_p1 = scmp.ne.s32.totalorder %s2893_s27, 0  ;;  %p44_p2 = scmp.eq.s32.totalorder %s2437_s16, 0 }
  0x34   : > { %p2897_p4 = scmp.ne.s32.totalorder %s2433_s15, %s2429_s14  ;;  %p2898_p6 = scmp.eq.s32.totalorder %s2522_s17, 1 }
  0x35   : > { %s2585_s24 = scalar_select %p2895_p1, %s2433_s15, %s36_s28  }
  0x36   : > { %p2593_p8 = por %p2898_p6, %p2897_p4  ;;  %p2218_p9 = scmp.lt.s32.totalorder %s2437_s16, 2 }
  0x37   : > { %2896 = sst [smem:[#allocation17_spill]] %s2585_s24  ;;  %s325_s11 = sand.u32 1, %s2433_s15  }
  0x38   : > { %s2899_s25 = scalar_select %p2593_p8, 1, 0 }
  0x39   : > { %p2900_p12 = pmov %p2897_p4  ;;  %s2602_s18 = sshll.u32 %s325_s11, 3 }
  0x3a   : > { %s2031_s22 = sshll.u32 %s2437_s16, 7  ;;  %s329_s28 = scalar_lea.vmem [#allocation2], %s2602_s18 }
  0x3b   : > { %p45_p13 = por %p44_p2, %p2900_p12  ;;  %s2608_s27 = scalar_lea.hbm %s2862_s0, %s2031_s22 }
  0x3c   : > { %s337_s29 = sshll.u32 %s329_s28, 4  ;;  %s2620_s26 = scalar_lea.hbm %s2863_s1, %s2031_s22  ;;  %s2615_s29 = int_to_ptr.vmem [resolvable:$true] %s337_s29 }
  0x3d   : > { %p2611_p11 = pnand %p2218_p9, %p45_p13  ;;  %s326_s23 = scalar_lea.sflag [#allocation3], %s325_s11 }
  0x3e   : > { %s2303_s24 = scalar_lea.hbm %s2608_s27, 128  ;;  %s2308_s20 = scalar_lea.hbm %s2862_s0, 256 }
  0x3f   : > { %p2304_p0 = scmp.ne.s32.totalorder %s2608_s27, %s2303_s24  ;;  %p2305_p3 = pneg %p2611_p11 }
  0x40   : > { %p2309_p10 = scmp.lt.u32.totalorder %s2608_s27, %s2862_s0  ;;  %p2310_p1 = scmp.lt.u32.totalorder %s2308_s20, %s2303_s24 }
  0x41   : > { %p2306_p5 = pnand %p2305_p3, %p2304_p0  ;;  %p2312_p4 = scmp.lt.u32.totalorder %s2303_s24, %s2608_s27 }
  0x42   : > { %p2311_p2 = por %p2310_p1, %p2309_p10 }
  0x43   : > { %p2307_p7 = pneg %p2306_p5 }
  0x44   : > { %p2313_p6 = por %p2312_p4, %p2311_p2 }
  0x46   : > { %p2314_p9 = pnand %p2313_p6, %p2307_p7 }
  0x48   : > { %2317 = shalt.err (!%p2314_p9)
}
  0x49   : > { %s2318_s4 = scalar_lea.vmem %s2615_s29, 128  ;;  %s2440_s15 = smov [#allocation2]  }
  0x4a   : > { %p2319_p12 = scmp.ne.s32.totalorder %s2615_s29, %s2318_s4  ;;  %s2323_s11 = sshll.u32 %s2440_s15, 4  ;;  %s2324_s11 = int_to_ptr.vmem [resolvable:$false] %s2323_s11 }
  0x4b   : > { %s2325_s10 = scalar_lea.vmem %s2324_s11, 256  ;;  %p2326_p5 = scmp.lt.s32.totalorder %s2615_s29, %s2324_s11 }
  0x4c   : > { %p2321_p13 = pnand %p2319_p12, %p2305_p3  ;;  %p2327_p10 = scmp.lt.s32.totalorder %s2325_s10, %s2318_s4 }
  0x4e   : > { %p2322_p0 = pneg %p2321_p13  ;;  %p2328_p1 = por %p2327_p10, %p2326_p5 }
  0x50   : > { %p2329_p2 = pnand %p2328_p1, %p2322_p0 }
  0x52   : > { %2332 = shalt.err (!%p2329_p2)
}
  0x53   : > { %2209 = dma.hbm_to_vmem [thread:$0]  (!%p2611_p11), %s2608_s27, 128, %s2615_s29, %s326_s23  }
  0x54   : > { %s344_s13 = sand.u32 1, %s2437_s16   ;;  %s348_s20 = scalar_lea.vmem [#allocation5], %s2602_s18 }
  0x55   : > { %s356_s24 = sshll.u32 %s348_s20, 4  ;;  %s345_s22 = scalar_lea.sflag [#allocation6], %s344_s13  ;;  %s357_s24 = int_to_ptr.vmem [resolvable:$true] %s356_s24 }
  0x56   : > { %s2333_s12 = scalar_lea.hbm %s2620_s26, 128  ;;  %s2338_s15 = scalar_lea.hbm %s2863_s1, 256 }
  0x57   : > { %p2334_p7 = scmp.ne.s32.totalorder %s2620_s26, %s2333_s12  ;;  %p2339_p9 = scmp.lt.u32.totalorder %s2620_s26, %s2863_s1 }
  0x58   : > { %p2340_p12 = scmp.lt.u32.totalorder %s2338_s15, %s2333_s12  ;;  %p2342_p0 = scmp.lt.u32.totalorder %s2333_s12, %s2620_s26 }
  0x59   : > { %p2336_p4 = pnand %p2334_p7, %p2305_p3 }
  0x5a   : > { %p2341_p13 = por %p2340_p12, %p2339_p9 }
  0x5b   : > { %p2337_p6 = pneg %p2336_p4 }
  0x5c   : > { %p2343_p5 = por %p2342_p0, %p2341_p13 }
  0x5e   : > { %p2344_p10 = pnand %p2343_p5, %p2337_p6 }
  0x60   : > { %2347 = shalt.err (!%p2344_p10)
}
  0x61   : > { %s2348_s18 = scalar_lea.vmem %s357_s24, 128  ;;  %s2441_s27 = smov [#allocation5]  }
  0x62   : > { %p2349_p1 = scmp.ne.s32.totalorder %s357_s24, %s2348_s18  ;;  %s2353_s29 = sshll.u32 %s2441_s27, 4  ;;  %s2354_s29 = int_to_ptr.vmem [resolvable:$false] %s2353_s29 }
  0x63   : > { %s2355_s23 = scalar_lea.vmem %s2354_s29, 256  ;;  %p2356_p4 = scmp.lt.s32.totalorder %s357_s24, %s2354_s29 }
  0x64   : > { %p2351_p2 = pnand %p2349_p1, %p2305_p3  ;;  %p2357_p8 = scmp.lt.s32.totalorder %s2355_s23, %s2348_s18 }
  0x66   : > { %p2352_p7 = pneg %p2351_p2  ;;  %p2358_p9 = por %p2357_p8, %p2356_p4 }
  0x68   : > { %p2359_p12 = pnand %p2358_p9, %p2352_p7 }
  0x6a   : > { %2362 = shalt.err (!%p2359_p12)
}
  0x6b   : > { %2212 = dma.hbm_to_vmem [thread:$0]  (!%p2611_p11), %s2620_s26, 128, %s357_s24, %s345_s22  }
  0x6c   : > { %p2902_p6 = scmp.ne.s32.totalorder %s2890_s21, 0 }
  0x6d   : > { %s2671_s13 = sand.u32 (!%p2902_p6), 1, %s2429_s14   ;;  %p2903_p8 = scmp.ne.s32.totalorder (!%p2902_p6), %s2887_s19, 0 }
  0x6e   : > { %365 = sbr.rel (%p2902_p6) target bundleno = 1408 (0x580), region = 60  ;;  %s2674_s20 = sshll.u32 (!%p2902_p6), %s2671_s13, 3 }
  0x6f   : > { %s368_s12 = scalar_lea.sflag (!%p2902_p6), [#allocation3], %s2671_s13  ;;  %s371_s28 = scalar_lea.vmem (!%p2902_p6), [#allocation2], %s2674_s20 }
  0x75   : > { %2408 = dma.done.wait (%p2903_p8), %s368_s12, 128  }
  0x76   : > { %2410 = vsyncadd (%p2903_p8), %s368_s12, 4294967168  ;;  %s376_s21 = sand.u32 1, %s2522_s17   ;;  %s380_s26 = scalar_lea.vmem [#allocation5], %s2674_s20 }
  0x77   : > { %s377_s30 = scalar_lea.sflag [#allocation6], %s376_s21 }
  0x78   : > { %2412 = dma.done.wait (%p2903_p8), %s377_s30, 128  }
  0x79   : > { %2414 = vsyncadd (%p2903_p8), %s377_s30, 4294967168  ;;  %p2904_p11 = scmp.eq.s32.totalorder %s2522_s17, 0 }
  0x7b   : > { %2416 = dma.done.wait (%p2904_p11), [#allocation6], 16   ;;  %p2905_p3 = pmov %p2904_p11 }
  0x7c   : > { %v2692_v0 = vld [vmem:[%s371_s28] sm:$0xff]  ;;  %v2694_v1 = vld [vmem:[%s380_s26] sm:$0xff]  ;;  %vm432_vm0 = vcmask 1043456   ;;  %v2442_v9 = vmov 0.0   ;;  %vm2443_vm1 = vmmov 0   ;;  %v442_v11 = vlaneseq  ;;  %s2444_s30 = smov 124  }
  0x7d   : > { %2418 = vsyncadd (%p2905_p3), [#allocation6], 4294967280  ;;  %v428_v2 = vadd.f32 %v2694_v1, %v2692_v0  ;;  %v439_v7 = vld [vmem:[%s2864_s2] sm:$0xf]  ;;  %2085 = vmatprep.subr.mxu0 %v2442_v9  ;;  %2087 = vmatprep.mubr.msk.f32.mxu0 %vm2443_vm1, %v2442_v9  ;;  %vm448_vm2 = vcmask 31744   ;;  %vm1381_vm4 = vcmask 24576  }
  0x7e   : > { %v452_v8 = vsel %vm432_vm0, %v439_v7, 0  ;;  %2070 = vmatprep.subr.mxu1 %v2442_v9  ;;  %2072 = vmatprep.mubr.msk.f32.mxu1 %vm2443_vm1, %v2442_v9  ;;  %v443_v12 = vand.u32 127, %v442_v11  ;;  %v2712_v13 = vshrl.u32 %v442_v11, 7  ;;  %v927_v28 = vld [vmem:[%s2870_s8] sm:$0xf]  ;;  %s2033_s4 = sshll.u32 %s2522_s17, 7 }
  0x7f   : > { %v430_v3 = vcombine.high %v428_v2, %v428_v2  ;;  %v433_v4 = vsel %vm432_vm0, %v428_v2, 0.0  ;;  %v455_v10 = vand.u32 4294901760, %v452_v8  ;;  %v933_v29 = vsel %vm432_vm0, %v927_v28, 0  ;;  %v900_v31 = vld [vmem:[%s2869_s7] sm:$0x1]  ;;  %s425_s15 = scalar_lea.vmem [#allocation8], %s2674_s20 }
  0x80   : > { %v446_v14 = vsub.s32 %v443_v12, %v2712_v13  ;;  %v2736_v30 = vand.u32 4294901760, %v933_v29  ;;  %v901_v32 = vadd.f32 0.001, %v900_v31  ;;  %v440_v35 = vld [vmem:[%s2865_s3] sm:$0x1]  ;;  %s1907_s11 = sshll.u32 %s425_s15, 4  ;;  %s2820_s11 = int_to_ptr.vmem [resolvable:$true] %s1907_s11 }
  0x81   : > { %v434_v5 = vsel %vm432_vm0, %v430_v3, 0.0  ;;  %2086 = vmatpush3.msra.mxu0 %v455_v10  ;;  %2071 = vmatpush3.msra.mxu1 %v455_v10  ;;  %v532_v17 = vsub.f32 %v452_v8, %v455_v10  ;;  %v903_v39 = vld [vmem:[%s2868_s6] sm:$0x1]  ;;  %v2024_v62 = vld [vmem:[%s2870_s8 + $0x4] sm:$0xf]  ;;  %s2906_s27 = sld [smem:[#allocation19_spill]] }
  0x82   : > { %v435_v6 = vadd.f32 %v434_v5, %v433_v4  ;;  %2075 = vmatprep.subr.mxu1 %v2442_v9  ;;  %2090 = vmatprep.subr.mxu0 %v2442_v9  ;;  %2259 = vrsqrt.f32 %v901_v32  ;;  %v906_v43 = vld [vmem:[#allocation7] sm:$0x1]  ;;  %v1402_v63 = vsel %vm432_vm0, %v2024_v62, 0  ;;  %v1013_v3 = vsub.f32 %v933_v29, %v2736_v30  ;;  %s1893_s23 = scalar_lea.sflag [#allocation4], %s2671_s13  ;;  %s2363_s12 = scalar_lea.vmem %s2820_s11, 128 }
  0x83   : > { %v533_v20 = vand.u32 4294901760, %v532_v17  ;;  %v908_v45 = vld [vmem:[%s2867_s5] sm:$0x1]  ;;  %v2756_v2 = vand.u32 4294901760, %v1402_v63  ;;  %p2364_p13 = scmp.ne.s32.totalorder %s2820_s11, %s2363_s12  ;;  %p2907_p0 = scmp.ne.s32.totalorder %s2899_s25, 0 }
  0x84   : > { %436 = vadd.xlane.f32.xlu0 %v435_v6  ;;  %v1014_v7 = vand.u32 4294901760, %v1013_v3  ;;  %v928_v28 = vld [vmem:[%s2871_s9] sm:$0x1]  ;;  %s2445_s17 = smov [#allocation8]  }
  0x85   : > { %v534_v23 = vsub.f32 %v532_v17, %v533_v20  ;;  %p2365_p5 = pnand %p2364_p13, %p2907_p0  ;;  %s2367_s20 = sshll.u32 %s2445_s17, 4  ;;  %s2368_s20 = int_to_ptr.vmem [resolvable:$false] %s2367_s20 }
  0x86   : > { %v1015_v11 = vsub.f32 %v1013_v3, %v1014_v7  ;;  %s2369_s28 = scalar_lea.vmem %s2368_s20, 256  ;;  %p2370_p1 = scmp.lt.s32.totalorder %s2820_s11, %s2368_s20 }
  0x87   : > { %v535_v26 = vand.u32 4294901760, %v534_v23  ;;  %s2818_s29 = scalar_lea.hbm %s2906_s27, %s2033_s4  ;;  %p2366_p10 = pneg %p2365_p5 }
  0x88   : > { %p2371_p2 = scmp.lt.s32.totalorder %s2369_s28, %s2363_s12 }
  0x8a   : > { %p2372_p7 = por %p2371_p2, %p2370_p1 }
  0x8c   : > { %v2260_v41 = vpop.eup %2259  ;;  %p2373_p4 = pnand %p2372_p7, %p2366_p10 }
 0x111   : > { %v437_v15 = vpop.xlane.xlu0 %436 }
 0x112   : > { %v438_v16 = vmul.f32 0.00390625, %v437_v15  ;;  %v1016_v15 = vand.u32 4294901760, %v1015_v11 }
 0x114   : > { %v447_v18 = vrot.slane %v438_v16, %v446_v14 }
 0x116   : > { %v449_v19 = vsel %vm448_vm2, %v447_v18, 0 }
 0x117   : > { %v520_v21 = vand.u32 4294901760, %v449_v19 }
 0x119   : > { %v521_v22 = vsub.f32 %v449_v19, %v520_v21 }
 0x11b   : > { %v522_v24 = vand.u32 4294901760, %v521_v22 }
 0x11d   : > { %2088 = vmatmul.mubr.f32.vlgmr.msra.gmra.mrb[0].mxu0 %v522_v24  ;;  %v523_v25 = vsub.f32 %v521_v22, %v522_v24 }
 0x11e   : > { %2091 = vmatpush3.msra.mxu0 %v533_v20  ;;  %2092 = vmatprep.mubr.msk.f32.mxu0 %vm2443_vm1, %v2442_v9 }
 0x11f   : > { %v524_v27 = vand.u32 4294901760, %v523_v25  ;;  %2095 = vmatprep.subr.mxu0 %v2442_v9 }
 0x121   : > { %2073 = vmatmul.mubr.f32.vlgmr.msra.gmra.mrb[0].mxu1 %v524_v27 }
 0x122   : > { %2076 = vmatpush3.msra.mxu1 %v535_v26  ;;  %2077 = vmatprep.mubr.msk.f32.mxu1 %vm2443_vm1, %v2442_v9 }
 0x123   : > { %2080 = vmatprep.subr.mxu1 %v2442_v9 }
 0x125   : > { %2093 = vmatmul.mubr.f32.vlgmr.msra.gmra.mrb[0].mxu0 %v520_v21 }
 0x126   : > { %2096 = vmatpush3.msra.mxu0 %v455_v10  ;;  %2097 = vmatprep.mubr.msk.f32.mxu0 %vm2443_vm1, %v2442_v9 }
 0x127   : > { %2130 = vmatprep.subr.mxu0 %v2442_v9 }
 0x129   : > { %2078 = vmatmul.mubr.f32.vlgmr.msra.gmra.mrb[0].mxu1 %v520_v21 }
 0x12a   : > { %2081 = vmatpush3.msra.mxu1 %v532_v17  ;;  %2082 = vmatprep.mubr.msk.f32.mxu1 %vm2443_vm1, %v2442_v9  ;;  %v1482_v17 = vsub.f32 %v1402_v63, %v2756_v2 }
 0x12b   : > { %2100 = vmatprep.subr.mxu1 %v2442_v9 }
 0x12c   : > { %v1483_v20 = vand.u32 4294901760, %v1482_v17 }
 0x12d   : > { %2098 = vmatmul.mubr.f32.vlgmr.msra.gmra.mrb[0].mxu0 %v520_v21 }
 0x12e   : > { %2132 = vmatprep.mubr.msk.f32.mxu0 %vm2443_vm1, %v2442_v9  ;;  %2131 = vmatpush3.msra.mxu0 %v2756_v2  ;;  %v1484_v23 = vsub.f32 %v1482_v17, %v1483_v20 }
 0x12f   : > { %2135 = vmatprep.subr.mxu0 %v2442_v9 }
 0x130   : > { %v1485_v26 = vand.u32 4294901760, %v1484_v23 }
 0x131   : > { %2083 = vmatmul.mubr.f32.vlgmr.msra.gmra.mrb[0].mxu1 %v521_v22 }
 0x132   : > { %2102 = vmatprep.mubr.msk.f32.mxu1 %vm2443_vm1, %v2442_v9  ;;  %2101 = vmatpush3.msra.mxu1 %v2736_v30 }
 0x133   : > { %2105 = vmatprep.subr.mxu1 %v2442_v9 }
 0x200   : > { %v896_v33 = vpop.f32.mrb[0].mxu0 }
 0x201   : > { %v2099_v34 = vpop.f32.mrb[1].mxu0 }
 0x204   : > { %v676_v36 = vpop.f32.mrb[0].mxu1 }
 0x205   : > { %v2160_v37 = vadd.f32 %v676_v36, %v440_v35  ;;  %v2084_v38 = vpop.f32.mrb[1].mxu1 }
 0x207   : > { %v2161_v40 = vadd.f32 %v2160_v37, %v896_v33  ;;  %v2025_v33 = vld [vmem:[%s2871_s9 + $0x1] sm:$0x1] }
 0x209   : > { %v904_v42 = vsub.f32 %v2161_v40, %v903_v39 }
 0x20b   : > { %v905_v44 = vmul.f32 %v2260_v41, %v904_v42 }
 0x20d   : > { %v907_v46 = vmul.f32 %v906_v43, %v905_v44 }
 0x20f   : > { %v909_v47 = vadd.f32 %v908_v45, %v907_v46 }
 0x211   : > { %v911_v48 = vand.u32 2147483647, %v909_v47  ;;  %v910_v59 = vmax.f32 %v909_v47, 0.0 }
 0x213   : > { %v912_v49 = vsub.f32 0.0, %v911_v48  ;;  %v1863_v48 = vsub.s32 0, %v2712_v13 }
 0x215   : > { %v913_v50 = vmul.f32 1.442695, %v912_v49 }
 0x217   : > { %2261 = vpow2.f32 %v913_v50 }
 0x221   : > { %v2262_v51 = vpop.eup %2261 }
 0x222   : > { %v915_v52 = vadd.f32 1.0, %v2262_v51  ;;  %v918_v53 = vmul.f32 -0.5, %v2262_v51  ;;  %v921_v55 = vand.u32 2147483647, %v2262_v51 }
 0x224   : > { %2263 = vlog2.f32 %v915_v52  ;;  %v919_v54 = vadd.f32 1.0, %v918_v53  ;;  %vm922_vm3 = vcmp.lt.f32.partialorder %v921_v55, 0.0004427343 }
 0x226   : > { %v920_v58 = vmul.f32 %v2262_v51, %v919_v54 }
 0x22e   : > { %v2264_v56 = vpop.eup %2263 }
 0x22f   : > { %v917_v57 = vmul.f32 0.6931472, %v2264_v56  ;;  %v1869_v56 = vcombine.high %v2692_v0, %v2692_v0 }
 0x231   : > { %v923_v60 = vsel %vm922_vm3, %v920_v58, %v917_v57  ;;  %v1881_v57 = vcombine.high %v2694_v1, %v2694_v1 }
 0x232   : > { %v924_v61 = vadd.f32 %v923_v60, %v910_v59 }
 0x234   : > { %2265 = vtanh.f32 %v924_v61 }
 0x23e   : > { %v2266_v4 = vpop.eup %2265 }
 0x23f   : > { %v926_v5 = vmul.f32 %v2266_v4, %v909_v47 }
 0x241   : > { %1397 = vrot.lane.b32.xlu0 %v926_v5, %s2444_s30  ;;  %v930_v6 = vsel %vm448_vm2, %v926_v5, 0 }
 0x242   : > { %v1001_v8 = vand.u32 4294901760, %v930_v6 }
 0x244   : > { %v1002_v10 = vsub.f32 %v930_v6, %v1001_v8 }
 0x246   : > { %v1003_v12 = vand.u32 4294901760, %v1002_v10 }
 0x248   : > { %v1004_v14 = vsub.f32 %v1002_v10, %v1003_v12 }
 0x24a   : > { %v1005_v16 = vand.u32 4294901760, %v1004_v14 }
 0x24c   : > { %2103 = vmatmul.mubr.f32.vlgmr.msra.gmra.mrb[2].mxu1 %v1005_v16 }
 0x24d   : > { %2106 = vmatpush3.msra.mxu1 %v1016_v15  ;;  %2107 = vmatprep.mubr.msk.f32.mxu1 %vm2443_vm1, %v2442_v9 }
 0x24e   : > { %2110 = vmatprep.subr.mxu1 %v2442_v9 }
 0x254   : > { %2108 = vmatmul.mubr.f32.vlgmr.msra.gmra.mrb[2].mxu1 %v1001_v8 }
 0x255   : > { %2111 = vmatpush3.msra.mxu1 %v1013_v3  ;;  %2112 = vmatprep.mubr.msk.f32.mxu1 %vm2443_vm1, %v2442_v9 }
 0x256   : > { %2115 = vmatprep.subr.mxu1 %v2442_v9 }
 0x25c   : > { %2113 = vmatmul.mubr.f32.vlgmr.msra.gmra.mrb[2].mxu1 %v1002_v10 }
 0x25d   : > { %2116 = vmatpush3.msra.mxu1 %v2736_v30  ;;  %2117 = vmatprep.mubr.msk.f32.mxu1 %vm2443_vm1, %v2442_v9 }
 0x25e   : > { %2120 = vmatprep.subr.mxu1 %v2442_v9 }
 0x264   : > { %2118 = vmatmul.mubr.f32.vlgmr.msra.gmra.mrb[2].mxu1 %v1003_v12 }
 0x265   : > { %2121 = vmatpush3.msra.mxu1 %v1014_v7  ;;  %2122 = vmatprep.mubr.msk.f32.mxu1 %vm2443_vm1, %v2442_v9 }
 0x266   : > { %2125 = vmatprep.subr.mxu1 %v2442_v9 }
 0x26c   : > { %2123 = vmatmul.mubr.f32.vlgmr.msra.gmra.mrb[2].mxu1 %v1001_v8 }
 0x26d   : > { %2126 = vmatpush3.msra.mxu1 %v2736_v30  ;;  %2127 = vmatprep.mubr.msk.f32.mxu1 %vm2443_vm1, %v2442_v9 }
 0x274   : > { %2128 = vmatmul.mubr.f32.vlgmr.msra.gmra.mrb[2].mxu1 %v1001_v8 }
 0x2b3   : > { %v1398_v18 = vpop.permute.xlu0 %1397 }
 0x2b4   : > { %v1399_v19 = vsel %vm448_vm2, %v1398_v18, 0 }
 0x2b5   : > { %v1470_v21 = vand.u32 4294901760, %v1399_v19 }
 0x2b7   : > { %v1471_v22 = vsub.f32 %v1399_v19, %v1470_v21 }
 0x2b9   : > { %v1472_v24 = vand.u32 4294901760, %v1471_v22 }
 0x2bb   : > { %v1473_v25 = vsub.f32 %v1471_v22, %v1472_v24 }
 0x2bd   : > { %v1474_v27 = vand.u32 4294901760, %v1473_v25 }
 0x2bf   : > { %2133 = vmatmul.mubr.f32.vlgmr.msra.gmra.mrb[2].mxu0 %v1474_v27 }
 0x2c0   : > { %2136 = vmatpush3.msra.mxu0 %v1485_v26  ;;  %2137 = vmatprep.mubr.msk.f32.mxu0 %vm2443_vm1, %v2442_v9 }
 0x2c1   : > { %2140 = vmatprep.subr.mxu0 %v2442_v9 }
 0x2c7   : > { %2138 = vmatmul.mubr.f32.vlgmr.msra.gmra.mrb[2].mxu0 %v1470_v21 }
 0x2c8   : > { %2141 = vmatpush3.msra.mxu0 %v1482_v17  ;;  %2142 = vmatprep.mubr.msk.f32.mxu0 %vm2443_vm1, %v2442_v9 }
 0x2c9   : > { %2145 = vmatprep.subr.mxu0 %v2442_v9 }
 0x2cf   : > { %2143 = vmatmul.mubr.f32.vlgmr.msra.gmra.mrb[2].mxu0 %v1471_v22 }
 0x2d0   : > { %2146 = vmatpush3.msra.mxu0 %v2756_v2  ;;  %2147 = vmatprep.mubr.msk.f32.mxu0 %vm2443_vm1, %v2442_v9 }
 0x2d1   : > { %2150 = vmatprep.subr.mxu0 %v2442_v9 }
 0x2d7   : > { %2148 = vmatmul.mubr.f32.vlgmr.msra.gmra.mrb[2].mxu0 %v1472_v24 }
 0x2d8   : > { %2151 = vmatpush3.msra.mxu0 %v1483_v20  ;;  %2152 = vmatprep.mubr.msk.f32.mxu0 %vm2443_vm1, %v2442_v9 }
 0x2d9   : > { %2155 = vmatprep.subr.mxu0 %v2442_v9 }
 0x2df   : > { %2153 = vmatmul.mubr.f32.vlgmr.msra.gmra.mrb[2].mxu0 %v1470_v21 }
 0x2e0   : > { %2156 = vmatpush3.msra.mxu0 %v2756_v2  ;;  %2157 = vmatprep.mubr.msk.f32.mxu0 %vm2443_vm1, %v2442_v9 }
 0x2e7   : > { %2158 = vmatmul.mubr.f32.vlgmr.msra.gmra.mrb[2].mxu0 %v1470_v21 }
 0x347   : > { %v1377_v29 = vpop.f32.mrb[2].mxu1 }
 0x348   : > { %v2162_v30 = vadd.f32 %v1377_v29, %v928_v28  ;;  %v2129_v31 = vpop.f32.mrb[3].mxu1 }
 0x34a   : > { %v1382_v32 = vsel %vm1381_vm4, %v2162_v30, -inf }
 0x34b   : > { %1383 = vmax.xlane.f32.xlu1 %v1382_v32 }
 0x3ba   : > { %v1846_v34 = vpop.f32.mrb[2].mxu0 }
 0x3bb   : > { %v2163_v35 = vadd.f32 %v2025_v33, %v1846_v34  ;;  %v2159_v36 = vpop.f32.mrb[3].mxu0 }
 0x3bd   : > { %v1850_v9 = vsel %vm1381_vm4, %v2163_v35, -inf }
 0x3be   : > { %1851 = vmax.xlane.f32.xlu1 %v1850_v9 }
 0x3d8   : > { %v1384_v37 = vpop.xlane.xlu1 %1383 }
 0x3d9   : > { %v1385_v38 = vsub.f32 %v2162_v30, %v1384_v37 }
 0x3db   : > { %v1386_v39 = vmul.f32 1.442695, %v1385_v38 }
 0x3dd   : > { %2267 = vpow2.f32 %v1386_v39 }
 0x3e7   : > { %v2268_v40 = vpop.eup %2267 }
 0x3e8   : > { %v1388_v41 = vsel %vm1381_vm4, %v2268_v40, 0.0 }
 0x3e9   : > { %1389 = vadd.xlane.f32.xlu1 %v1388_v41 }
 0x44b   : > { %v1852_v42 = vpop.xlane.xlu1 %1851 }
 0x44c   : > { %v1853_v43 = vsub.f32 %v2163_v35, %v1852_v42 }
 0x44e   : > { %v1854_v44 = vmul.f32 1.442695, %v1853_v43 }
 0x450   : > { %2269 = vpow2.f32 %v1854_v44 }
 0x45a   : > { %v2270_v45 = vpop.eup %2269 }
 0x45b   : > { %v1856_v46 = vsel %vm1381_vm4, %v2270_v45, 0.0 }
 0x45c   : > { %1857 = vadd.xlane.f32.xlu1 %v1856_v46 }
 0x476   : > { %v1390_v47 = vpop.xlane.xlu1 %1389 }
 0x477   : > { %2271 = vrcp.f32 %v1390_v47 }
 0x481   : > { %v2272_v49 = vpop.eup %2271 }
 0x482   : > { %v1392_v50 = vmul.f32 %v2272_v49, %v2268_v40 }
 0x484   : > { %v1864_v51 = vrot.slane %v1392_v50, %v1863_v48 }
 0x486   : > { %1866 = vbcast.lane.b32.xlu1 %v1864_v51, 256 }
 0x4e9   : > { %v1858_v52 = vpop.xlane.xlu1 %1857 }
 0x4ea   : > { %2273 = vrcp.f32 %v1858_v52 }
 0x4f4   : > { %v2274_v53 = vpop.eup %2273 }
 0x4f5   : > { %v1860_v54 = vmul.f32 %v2274_v53, %v2270_v45 }
 0x4f7   : > { %v1876_v55 = vrot.slane %v1860_v54, %v1863_v48 }
 0x4f8   : > { %v1867_v13 = vpop.permute.xlu1 %1866 }
 0x4f9   : > { %1878 = vbcast.lane.b32.xlu0 %v1876_v55, 256  ;;  %v1871_v59 = vmul.f32 %v1867_v13, %v2692_v0  ;;  %v1872_v60 = vmul.f32 %v1869_v56, %v1867_v13 }
 0x56b   : > { %v1879_v58 = vpop.permute.xlu0 %1878 }
 0x56c   : > { %v1883_v61 = vmul.f32 %v1879_v58, %v2694_v1  ;;  %v1884_v62 = vmul.f32 %v1881_v57, %v1879_v58 }
 0x56e   : > { %v1885_v63 = vadd.f32 %v1883_v61, %v1871_v59  ;;  %v1886_v2 = vadd.f32 %v1884_v62, %v1872_v60 }
 0x570   : > { %v1889_v3 = vcombine.low %v1885_v63, %v1886_v2 }
 0x572   : > { %1891 = vst [vmem:[%s425_s15] sm:$0xff] %v1889_v3 }
 0x573   : > { %2376 = shalt.err (!%p2373_p4)
}
 0x574   : > { %s2377_s13 = scalar_lea.hbm %s2818_s29, 128  ;;  %s2381_s26 = scalar_lea.hbm %s2906_s27, 256 }
 0x575   : > { %p2378_p9 = scmp.ne.s32.totalorder %s2818_s29, %s2377_s13  ;;  %p2382_p8 = scmp.lt.u32.totalorder %s2818_s29, %s2906_s27 }
 0x576   : > { %p2383_p11 = scmp.lt.u32.totalorder %s2381_s26, %s2377_s13  ;;  %p2385_p13 = scmp.lt.u32.totalorder %s2377_s13, %s2818_s29 }
 0x577   : > { %p2379_p12 = pnand %p2378_p9, %p2907_p0 }
 0x578   : > { %p2384_p3 = por %p2383_p11, %p2382_p8 }
 0x579   : > { %p2380_p6 = pneg %p2379_p12 }
 0x57a   : > { %p2386_p5 = por %p2385_p13, %p2384_p3 }
 0x57c   : > { %p2387_p10 = pnand %p2386_p5, %p2380_p6 }
 0x57e   : > { %2390 = shalt.err (!%p2387_p10)
}
 0x57f   : > { %2200 = dma.vmem_to_hbm [thread:$0]  (%p2907_p0), %s2820_s11, 128, %s2818_s29, %s1893_s23  }
 0x580 PF: > { %s2908_s22 = sld [smem:[#allocation13_spill]]  ;;  %s2909_s4 = sld [smem:[#allocation15_spill]] }
 0x581   : > { %p2911_p2 = scmp.ge.s32.totalorder %s2437_s16, 2 }
 0x586   : > { %s1919_s15 = sand.u32 1, %s2908_s22   ;;  %p2910_p1 = scmp.ne.s32.totalorder %s2909_s4, 0 }
 0x587   : > { %s1920_s10 = scalar_lea.sflag [#allocation4], %s1919_s15 }
 0x588   : > { %p2214_p7 = pnand %p2911_p2, %p2910_p1 }
 0x58a   : > { %2420 = dma.done.wait (!%p2214_p7), %s1920_s10, 128  }
 0x58b   : > { %2422 = vsyncadd (!%p2214_p7), %s1920_s10, 4294967168  ;;  %s2912_s16 = sld [smem:[#allocation16_spill]]  ;;  %s2913_s18 = sld [smem:[#allocation14_spill]] }
 0x58c   : > { %s2914_s15 = sld [smem:[#allocation17_spill]]  ;;  %s2915_s13 = smov %s2429_s14 }
 0x591   : > { %p26_p4 = scmp.ge.s32.totalorder %s2912_s16, 4   ;;  %s2916_s14 = smov %s2913_s18 }
 0x593   :  { %28 = sbr.rel (!%p26_p4) target bundleno = 10 (0xa), region = 124 }
 0x59a   :  { %1925 = vsyncpa [#allocation3], 1 }
 0x59b   :  { %1927 = vsyncpa [#allocation3 + $0x1], 1 }
 0x59c   :  { %1928 = vsyncpa [#allocation6], 1 }
 0x59d   :  { %1930 = vsyncpa [#allocation6 + $0x1], 1 }
 0x59e   :  { %1931 = vsyncpa [#allocation4], 1 }
 0x59f   :  { %1933 = vsyncpa [#allocation4 + $0x1], 1 }

</bundles_post_ra>
